<compile_context>
chip_gen: v5e
topology: v5e:2x2
jax: 0.10.0
libtpu: 0.0.40
codegen_flags: <defaults>
</compile_context>

<pallas_src>
import functools
import typing

import jax
import jax.numpy as jnp
from jax.experimental import pallas as pl
from jax.experimental.pallas import tpu as pltpu

LANE = 128  # TPU lane width


def _round_up(x: int, m: int) -> int:
    return (x + m - 1) // m * m


def _pad2d(a, rows: int, cols: int):
    r, c = a.shape
    return jnp.pad(a, ((0, rows - r), (0, cols - c)))


def _probe_buffered() -> bool:
    """Check once whether this jax build accepts pipeline_mode=pl.Buffered(1)."""
    try:
        pl.BlockSpec((8, LANE), lambda i: (0, 0), pipeline_mode=pl.Buffered(1))
        return True
    except Exception:
        return False


_HAS_BUFFERED = _probe_buffered()


# --------------------------------------------------------------------------
# Kernel
# --------------------------------------------------------------------------
def _make_encoder_kernel(num_hidden_layers: int):
    """Fused MLP-encoder kernel for a fixed number of hidden-to-hidden layers.

    Ref order (positional):
      x, W_proj, b_proj, [W_i, b_i] * num_hidden_layers, W_head, b_head,
      (output) head_out
    W_head / b_head are the z_mu|z_log_var heads fused along out-features.
    Weights are bf16, biases f32; all matmuls accumulate in f32 on the MXU.
    """
    n_param_refs = 2 * (num_hidden_layers + 2)

    def kernel(x_ref, *refs):
        param_refs = refs[:n_param_refs]
        out_ref = refs[n_param_refs]

        x = x_ref[...]  # bf16 activations straight into the MXU

        # project_from_input (NO activation afterwards, matching the module)
        h = jnp.dot(x, param_refs[0][...],
                    preferred_element_type=jnp.float32) + param_refs[1][...]
        h = h.astype(jnp.bfloat16)

        idx = 2
        for _ in range(num_hidden_layers):
            h = jnp.dot(h, param_refs[idx][...],
                        preferred_element_type=jnp.float32) + param_refs[idx + 1][...]
            # bf16 epilogue: cast then ReLU (identical to ReLU-then-cast),
            # halves elementwise vreg traffic on v6e/v7x.
            h = jnp.maximum(h.astype(jnp.bfloat16), 0.0)
            idx += 2

        # Fused z_mu | z_log_var head: one lane-dense matmul + one store.
        out = jnp.dot(h, param_refs[idx][...],
                      preferred_element_type=jnp.float32) + param_refs[idx + 1][...]
        out_ref[...] = out.astype(out_ref.dtype)

    return kernel


# --------------------------------------------------------------------------
# Parameter init / prep (prep is cached per params object)
# --------------------------------------------------------------------------
def init_encoder_params(key, input_dim: int, hidden_dims: typing.List[int],
                        latent_dim: int):
    """PyTorch-style U(-1/sqrt(fan_in), 1/sqrt(fan_in)) init (f32 master copy).

    Weights are stored as (in_features, out_features) — the transpose of
    nn.Linear.weight — so the kernel runs plain `x @ W + b`.
    """
    layer_shapes = [(input_dim, hidden_dims[0])]
    for i in range(1, len(hidden_dims)):
        layer_shapes.append((hidden_dims[i - 1], hidden_dims[i]))
    layer_shapes.append((hidden_dims[-1], latent_dim))  # z_mu
    layer_shapes.append((hidden_dims[-1], latent_dim))  # z_log_var

    params = []
    for fan_in, fan_out in layer_shapes:
        key, wk, bk = jax.random.split(key, 3)
        bound = 1.0 / jnp.sqrt(jnp.float32(fan_in))
        W = jax.random.uniform(wk, (fan_in, fan_out), jnp.float32, -bound, bound)
        b = jax.random.uniform(bk, (1, fan_out), jnp.float32, -bound, bound)
        params.append((W, b))
    return params


def prepare_encoder_params(params):
    """Fuses the two latent heads, pads all feature dims to multiples of 128,
    casts weights to bf16 (biases stay f32).

    Returns (flat_params_tuple, in_pad, head_pad, latent_dim, feat_pads).
    """
    input_dim = params[0][0].shape[0]
    latent_dim = params[-1][0].shape[1]

    (Wp, bp), *rest = params
    hidden = rest[:-2]
    (Wmu, bmu), (Wlv, blv) = rest[-2], rest[-1]

    W_head = jnp.concatenate([Wmu, Wlv], axis=1)   # (hidden, 2*latent)
    b_head = jnp.concatenate([bmu, blv], axis=1)   # (1, 2*latent)
    layers = [(Wp, bp)] + list(hidden) + [(W_head, b_head)]

    in_pad = _round_up(input_dim, LANE)
    prev = in_pad
    flat, feat_pads = [], []
    for W, b in layers:
        fout_p = _round_up(W.shape[1], LANE)
        flat.append(_pad2d(W, prev, fout_p).astype(jnp.bfloat16))
        flat.append(_pad2d(b, 1, fout_p).astype(jnp.float32))
        feat_pads.append(fout_p)
        prev = fout_p
    head_pad = _round_up(2 * latent_dim, LANE)
    return tuple(flat), in_pad, head_pad, latent_dim, tuple(feat_pads)


# Cache prepared (padded / fused / bf16) params keyed on the params object so
# the head-concat + pad + cast ops run once, not on every forward.
_PREP_CACHE: dict = {}


def get_prepared_params(params):
    key = id(params)
    hit = _PREP_CACHE.get(key)
    if hit is not None and hit[0] is params:
        return hit[1]
    prepared = prepare_encoder_params(params)
    _PREP_CACHE[key] = (params, prepared)
    return prepared


# --------------------------------------------------------------------------
# Tiling / VMEM sizing
# --------------------------------------------------------------------------
def _choose_batch_tile(B: int) -> int:
    """Largest tile (<=512, multiple of 16 for bf16 sublane packing) giving
    >= 4 grid steps (2 per TensorCore on v7x => per-core DMA/compute overlap);
    fall back to >= 2 steps, then the whole batch."""
    for min_steps in (4, 2):
        for tb in (512, 256, 128, 64, 32, 16):
            if B % tb == 0 and B // tb >= min_steps:
                return tb
    return B


def _derived_vmem_limit(params_flat, tb, in_pad, head_pad, feat_pads,
                        out_bytes_per_elem):
    """Size the scoped-VMEM limit from the actual resident set + headroom."""
    weight_bytes = sum(int(p.size) * p.dtype.itemsize for p in params_flat)
    x_bytes = 2 * tb * in_pad * 2                      # double-buffered bf16 X
    o_bytes = 2 * tb * head_pad * out_bytes_per_elem   # double-buffered output
    widest = max(list(feat_pads) + [in_pad, head_pad])
    act_bytes = 3 * tb * widest * 4                    # live f32/bf16 temps
    total = weight_bytes + x_bytes + o_bytes + act_bytes
    total = int(total * 1.5) + (4 << 20)               # headroom for Mosaic
    # TODO(synk): if weight_bytes alone exceeds ~40 MiB (v7x has only 64 MiB
    # VMEM), switch to a weight-tiled / pltpu.emit_pipeline variant instead of
    # keeping every layer resident.
    return int(min(max(total, 8 << 20), 96 << 20))


# --------------------------------------------------------------------------
# pallas_call wrapper (pad/cast of X and head split fused into the same jit)
# --------------------------------------------------------------------------
@functools.partial(
    jax.jit,
    static_argnames=("in_pad", "latent_dim", "batch_tile",
                     "single_buffer_weights", "vmem_limit_bytes", "out_dtype"))
def _encoder_pallas(X, params_flat, *, in_pad, latent_dim, batch_tile,
                    single_buffer_weights, vmem_limit_bytes, out_dtype):
    B, input_dim = X.shape
    num_layers = len(params_flat) // 2        # proj + hiddens + fused head
    num_hidden_layers = num_layers - 2
    head_pad = params_flat[-1].shape[-1]
    tb = batch_tile

    # Input pad + bf16 cast fused with the pallas_call in one XLA program.
    Xp = jnp.pad(X, ((0, 0), (0, in_pad - input_dim))).astype(jnp.bfloat16)

    kernel = _make_encoder_kernel(num_hidden_layers)

    # Grid-invariant parameter blocks: single-buffer them (constant index_map
    # => double buffering is pure VMEM waste).
    weight_kwargs = {}
    if single_buffer_weights and _HAS_BUFFERED:
        weight_kwargs = dict(pipeline_mode=pl.Buffered(1))

    in_specs = [pl.BlockSpec((tb, in_pad), lambda i: (i, 0))]
    for p in params_flat:
        in_specs.append(pl.BlockSpec(p.shape, lambda i: (0, 0), **weight_kwargs))

    out_specs = pl.BlockSpec((tb, head_pad), lambda i: (i, 0))
    out_shape = jax.ShapeDtypeStruct((B, head_pad), out_dtype)

    head = pl.pallas_call(
        kernel,
        out_shape=out_shape,
        grid_spec=pltpu.PrefetchScalarGridSpec(
            num_scalar_prefetch=0,
            grid=(B // tb,),
            in_specs=in_specs,
            out_specs=out_specs,
        ),
        compiler_params=pltpu.CompilerParams(
            dimension_semantics=("parallel",),
            vmem_limit_bytes=vmem_limit_bytes,
        ),
    )(Xp, *params_flat)

    # Split the fused lane-dense head inside the same jit (no extra dispatch).
    return head[:, :latent_dim], head[:, latent_dim:2 * latent_dim]


def encoder_forward(batch: typing.Dict, params, *, batch_tile=None,
                    out_dtype=jnp.float32) -> typing.Dict:
    """Mirrors Encoder.forward: adds 'z_mu' and 'z_log_var' keys to batch.

    `out_dtype=jnp.bfloat16` halves the output HBM writeback if downstream
    tolerates it (default f32 matches the module)."""
    X = batch["X"]
    B, _ = X.shape

    params_flat, in_pad, head_pad, latent_dim, feat_pads = get_prepared_params(params)

    tb = batch_tile if batch_tile is not None else _choose_batch_tile(B)
    assert B % tb == 0, "batch must be divisible by the batch tile"
    assert tb == B or tb % 16 == 0, \
        "batch tile must be a multiple of 16 (bf16 sublane packing)"

    vmem = _derived_vmem_limit(params_flat, tb, in_pad, head_pad, feat_pads,
                               jnp.dtype(out_dtype).itemsize)

    z_mu, z_log_var = _encoder_pallas(
        X, params_flat, in_pad=in_pad, latent_dim=latent_dim, batch_tile=tb,
        single_buffer_weights=True, vmem_limit_bytes=vmem, out_dtype=out_dtype)

    batch["z_mu"] = z_mu
    batch["z_log_var"] = z_log_var
    return batch


# --------------------------------------------------------------------------
# Pure-JAX reference (bf16 MXU matmuls + f32 accumulation, like the kernel)
# --------------------------------------------------------------------------
def _reference_forward(X, params, matmul_dtype=jnp.bfloat16):
    (Wp, bp), *rest = params
    hidden = rest[:-2]
    (Wmu, bmu), (Wlv, blv) = rest[-2], rest[-1]

    def mm(a, w):
        return jnp.dot(a.astype(matmul_dtype), w.astype(matmul_dtype),
                       preferred_element_type=jnp.float32)

    h = mm(X, Wp) + bp                       # no activation after projection
    for W, b in hidden:
        h = jnp.maximum(mm(h, W) + b, 0.0)   # Linear + ReLU
    return mm(h, Wmu) + bmu, mm(h, Wlv) + blv


if __name__ == "__main__":
    # Small, module-consistent shapes (padded to 128 lanes inside the wrapper).
    batch_size = 64
    input_dim = 32
    hidden_dims = [64, 64]
    latent_dim = 16

    key = jax.random.PRNGKey(0)
    key, xk = jax.random.split(key)
    X = jax.random.normal(xk, (batch_size, input_dim), jnp.float32)

    params = init_encoder_params(key, input_dim, hidden_dims, latent_dim)

    batch = {"X": X}
    batch = encoder_forward(batch, params)
    z_mu = jax.block_until_ready(batch["z_mu"])
    z_log_var = jax.block_until_ready(batch["z_log_var"])

    # Second call exercises the prep cache + jit cache (no re-prep dispatches).
    batch2 = encoder_forward({"X": X}, params)
    jax.block_until_ready(batch2["z_mu"])

    # Correctness check against a pure-JAX reference with matching precision
    # (bf16 matmuls, f32 accumulation -> not bit-parity with f32 PyTorch).
    ref_mu, ref_lv = _reference_forward(X, params)
    assert z_mu.shape == (batch_size, latent_dim)
    assert z_log_var.shape == (batch_size, latent_dim)
    assert jnp.allclose(z_mu, ref_mu, atol=2e-2, rtol=2e-2)
    assert jnp.allclose(z_log_var, ref_lv, atol=2e-2, rtol=2e-2)
    assert jnp.allclose(batch2["z_mu"], z_mu)

    print("KERNEL_OK")
</pallas_src>

<mosaic_0001>
module attributes {stable_mosaic.version = 11 : i64} {
  func.func @kernel(%arg0: i32, %arg1: memref<16x128xbf16, #tpu.memory_space<vmem>>, %arg2: memref<128x128xbf16, #tpu.memory_space<vmem>>, %arg3: memref<1x128xf32, #tpu.memory_space<vmem>>, %arg4: memref<128x128xbf16, #tpu.memory_space<vmem>>, %arg5: memref<1x128xf32, #tpu.memory_space<vmem>>, %arg6: memref<128x128xbf16, #tpu.memory_space<vmem>>, %arg7: memref<1x128xf32, #tpu.memory_space<vmem>>, %arg8: memref<16x128xf32, #tpu.memory_space<vmem>>) attributes {dimension_semantics = [#tpu.dimension_semantics<parallel>], iteration_bounds = array<i64: 4>, scalar_prefetch = 0 : i64, scratch_operands = 0 : i64, tpu.core_type = #tpu.core_type<tc>, window_params = [{transform_indices = @transform_0, window_bounds = array<i64: 16, 128>}, {pipeline_mode = #tpu.pipeline_mode<synchronous>, transform_indices = @transform_1, window_bounds = array<i64: 128, 128>}, {pipeline_mode = #tpu.pipeline_mode<synchronous>, transform_indices = @transform_2, window_bounds = array<i64: 1, 128>}, {pipeline_mode = #tpu.pipeline_mode<synchronous>, transform_indices = @transform_3, window_bounds = array<i64: 128, 128>}, {pipeline_mode = #tpu.pipeline_mode<synchronous>, transform_indices = @transform_4, window_bounds = array<i64: 1, 128>}, {pipeline_mode = #tpu.pipeline_mode<synchronous>, transform_indices = @transform_5, window_bounds = array<i64: 128, 128>}, {pipeline_mode = #tpu.pipeline_mode<synchronous>, transform_indices = @transform_6, window_bounds = array<i64: 1, 128>}, {transform_indices = @transform_7, window_bounds = array<i64: 16, 128>}]} {
    %c0 = arith.constant 0 : index
    %c0_0 = arith.constant 0 : index
    %0 = vector.load %arg1[%c0, %c0_0] : memref<16x128xbf16, #tpu.memory_space<vmem>>, vector<16x128xbf16>
    %c0_1 = arith.constant 0 : index
    %c0_2 = arith.constant 0 : index
    %1 = vector.load %arg2[%c0_1, %c0_2] : memref<128x128xbf16, #tpu.memory_space<vmem>>, vector<128x128xbf16>
    %cst = arith.constant dense<0.000000e+00> : vector<16x128xf32>
    %2 = tpu.matmul %0, %1, %cst {dimension_numbers = #tpu.dot_dimension_numbers<[1], [0], [0], [1], [0, 0, 1, 1], [], []>} : vector<16x128xbf16>, vector<128x128xbf16>, vector<16x128xf32> -> vector<16x128xf32>
    %c0_3 = arith.constant 0 : index
    %c0_4 = arith.constant 0 : index
    %3 = vector.load %arg3[%c0_3, %c0_4] : memref<1x128xf32, #tpu.memory_space<vmem>>, vector<1x128xf32>
    %4 = vector.broadcast %3 : vector<1x128xf32> to vector<16x128xf32>
    %5 = arith.addf %2, %4 : vector<16x128xf32>
    %6 = arith.truncf %5 : vector<16x128xf32> to vector<16x128xbf16>
    %c0_5 = arith.constant 0 : index
    %c0_6 = arith.constant 0 : index
    %7 = vector.load %arg4[%c0_5, %c0_6] : memref<128x128xbf16, #tpu.memory_space<vmem>>, vector<128x128xbf16>
    %cst_7 = arith.constant dense<0.000000e+00> : vector<16x128xf32>
    %8 = tpu.matmul %6, %7, %cst_7 {dimension_numbers = #tpu.dot_dimension_numbers<[1], [0], [0], [1], [0, 0, 1, 1], [], []>} : vector<16x128xbf16>, vector<128x128xbf16>, vector<16x128xf32> -> vector<16x128xf32>
    %c0_8 = arith.constant 0 : index
    %c0_9 = arith.constant 0 : index
    %9 = vector.load %arg5[%c0_8, %c0_9] : memref<1x128xf32, #tpu.memory_space<vmem>>, vector<1x128xf32>
    %10 = vector.broadcast %9 : vector<1x128xf32> to vector<16x128xf32>
    %11 = arith.addf %8, %10 : vector<16x128xf32>
    %12 = arith.truncf %11 : vector<16x128xf32> to vector<16x128xbf16>
    %cst_10 = arith.constant 0.000000e+00 : bf16
    %13 = vector.broadcast %cst_10 : bf16 to vector<16x128xbf16>
    %14 = arith.maximumf %12, %13 : vector<16x128xbf16>
    %c0_11 = arith.constant 0 : index
    %c0_12 = arith.constant 0 : index
    %15 = vector.load %arg6[%c0_11, %c0_12] : memref<128x128xbf16, #tpu.memory_space<vmem>>, vector<128x128xbf16>
    %cst_13 = arith.constant dense<0.000000e+00> : vector<16x128xf32>
    %16 = tpu.matmul %14, %15, %cst_13 {dimension_numbers = #tpu.dot_dimension_numbers<[1], [0], [0], [1], [0, 0, 1, 1], [], []>} : vector<16x128xbf16>, vector<128x128xbf16>, vector<16x128xf32> -> vector<16x128xf32>
    %c0_14 = arith.constant 0 : index
    %c0_15 = arith.constant 0 : index
    %17 = vector.load %arg7[%c0_14, %c0_15] : memref<1x128xf32, #tpu.memory_space<vmem>>, vector<1x128xf32>
    %18 = vector.broadcast %17 : vector<1x128xf32> to vector<16x128xf32>
    %19 = arith.addf %16, %18 : vector<16x128xf32>
    %c0_16 = arith.constant 0 : index
    %c0_17 = arith.constant 0 : index
    %20 = vector.load %arg8[%c0_16, %c0_17] : memref<16x128xf32, #tpu.memory_space<vmem>>, vector<16x128xf32>
    tpu.vector_store %arg8[%c0_16, %c0_17], %19 {strides = array<i32>} : memref<16x128xf32, #tpu.memory_space<vmem>>, vector<16x128xf32>,
    return
  }
  func.func @transform_0(%arg0: i32) -> (i32, i32) {
    %c0_i32 = arith.constant 0 : i32
    %c0_i32_0 = arith.constant 0 : i32
    return %arg0, %c0_i32 : i32, i32
  }
  func.func @transform_1(%arg0: i32) -> (i32, i32) {
    %c0_i32 = arith.constant 0 : i32
    %c0_i32_0 = arith.constant 0 : i32
    %c0_i32_1 = arith.constant 0 : i32
    return %c0_i32, %c0_i32_0 : i32, i32
  }
  func.func @transform_2(%arg0: i32) -> (i32, i32) {
    %c0_i32 = arith.constant 0 : i32
    %c0_i32_0 = arith.constant 0 : i32
    %c0_i32_1 = arith.constant 0 : i32
    return %c0_i32, %c0_i32_0 : i32, i32
  }
  func.func @transform_3(%arg0: i32) -> (i32, i32) {
    %c0_i32 = arith.constant 0 : i32
    %c0_i32_0 = arith.constant 0 : i32
    %c0_i32_1 = arith.constant 0 : i32
    return %c0_i32, %c0_i32_0 : i32, i32
  }
  func.func @transform_4(%arg0: i32) -> (i32, i32) {
    %c0_i32 = arith.constant 0 : i32
    %c0_i32_0 = arith.constant 0 : i32
    %c0_i32_1 = arith.constant 0 : i32
    return %c0_i32, %c0_i32_0 : i32, i32
  }
  func.func @transform_5(%arg0: i32) -> (i32, i32) {
    %c0_i32 = arith.constant 0 : i32
    %c0_i32_0 = arith.constant 0 : i32
    %c0_i32_1 = arith.constant 0 : i32
    return %c0_i32, %c0_i32_0 : i32, i32
  }
  func.func @transform_6(%arg0: i32) -> (i32, i32) {
    %c0_i32 = arith.constant 0 : i32
    %c0_i32_0 = arith.constant 0 : i32
    %c0_i32_1 = arith.constant 0 : i32
    return %c0_i32, %c0_i32_0 : i32, i32
  }
  func.func @transform_7(%arg0: i32) -> (i32, i32) {
    %c0_i32 = arith.constant 0 : i32
    %c0_i32_0 = arith.constant 0 : i32
    return %arg0, %c0_i32 : i32, i32
  }
}

</mosaic_0001>

<bundles_post_ra>
// kernel: _encoder_pallas.1
= control target key start
LH: loop header
LB: loop body
LE: loop exit
PB: predicated region body
PF: predicated region fallthrough
CT: control target
= control target key end

     0   :  { %12 = vsyncpa [#allocation3], 0  ;;  %s878_s24 = smov 0   ;;  %s959_s0 = inlined_call_operand.vmem [shape: bf16[64,128], index: 0, kind: input, shape index: {}]   ;;  %s960_s1 = inlined_call_operand.vmem [shape: bf16[128,128], index: 1, kind: input, shape index: {}]   ;;  %s961_s2 = inlined_call_operand.vmem [shape: f32[1,128], index: 2, kind: input, shape index: {}]   ;;  %s962_s3 = inlined_call_operand.vmem [shape: bf16[128,128], index: 3, kind: input, shape index: {}]   ;;  %s963_s4 = inlined_call_operand.vmem [shape: f32[1,128], index: 4, kind: input, shape index: {}]   ;;  %s964_s5 = inlined_call_operand.hbm [shape: bf16[128,128], index: 5, kind: input, shape index: {}]   ;;  %s965_s6 = inlined_call_operand.vmem [shape: f32[1,128], index: 6, kind: input, shape index: {}]   ;;  %s966_s7 = inlined_call_operand.vmem [shape: f32[64,128], index: 7, kind: output, shape index: {}]  }
   0x1 LB: > { %s224_s27 = sshll.u32 %s964_s5, 4  ;;  %s631_s28 = sadd.s32 4294967295, %s833_s24   ;;  %s833_s24 = sphi %s878_s24, %s18_s24   ;;  %s225_s27 = int_to_ptr.hbm [resolvable:$true] %s224_s27 }
   0x2   : > { %p633_p0 = scmp.ge.s32.totalorder %s833_s24, 1  ;;  %p201_p1 = scmp.lt.s32.totalorder %s833_s24, 5 }
   0x3   : > { %p777_p2 = scmp.eq.s32.totalorder %s631_s28, 0  ;;  %s835_s29 = smov [#allocation2]  }
   0x4   : > { %p202_p3 = pnand %p633_p0, %p201_p1  ;;  %s226_s30 = sshll.u32 %s835_s29, 4  ;;  %s227_s30 = int_to_ptr.vmem [resolvable:$true] %s226_s30 }
   0x5   : > { %s836_s8 = smov 64   ;;  %s837_s9 = smov 4  }
   0x6   : > { %p773_p4 = pneg %p202_p3  ;;  %254 = sbr.rel (%p202_p3) target bundleno = 465 (0x1d1), region = 48 }
   0x8   : > { %p774_p5 = pnand %p777_p2, %p773_p4 }
   0xa   : > { %776 = dma.hbm_to_vmem [thread:$0]  (!%p774_p5), %s225_s27, 1024, %s227_s30, [#allocation3], %s836_s8, %s836_s8, %s837_s9  }
   0xb   : > { %828 = dma.done.wait (%p777_p2), [#allocation3], 1024  }
   0xc   : > { %830 = vsyncadd (%p777_p2), [#allocation3], 4294966272  ;;  %v752_v0 = vld [vmem:[%s960_s1 + $0x38] sm:$0xff]  ;;  %v751_v1 = vld [vmem:[%s960_s1 + $0x30] sm:$0xff]  ;;  %s638_s25 = sshll.u32 %s631_s28, 1 }
   0xd   : > { %375 = vmatpush.bf16.msra.mxu0 %v752_v0  ;;  %v760_v2 = vld [vmem:[%s962_s3 + $0x38] sm:$0xff]  ;;  %v759_v3 = vld [vmem:[%s962_s3 + $0x30] sm:$0xff]  ;;  %v750_v4 = vld [vmem:[%s960_s1 + $0x28] sm:$0xff]  ;;  %p288_p6 = scmp.lt.s32.totalorder %s638_s25, 7 }
   0xe   : > { %458 = vmatpush.bf16.msra.mxu1 %v760_v2  ;;  %v758_v5 = vld [vmem:[%s962_s3 + $0x28] sm:$0xff]  ;;  %v749_v6 = vld [vmem:[%s960_s1 + $0x20] sm:$0xff]  ;;  %v748_v8 = vld [vmem:[%s960_s1 + $0x18] sm:$0xff] }
   0xf   : > { %v757_v7 = vld [vmem:[%s962_s3 + $0x20] sm:$0xff]  ;;  %v756_v9 = vld [vmem:[%s962_s3 + $0x18] sm:$0xff]  ;;  %v747_v10 = vld [vmem:[%s960_s1 + $0x10] sm:$0xff]  ;;  %s968_s25 = smov (!%p288_p6, %s638_s25), 7 }
  0x10   : > { %v746_v11 = vld [vmem:[%s960_s1 + $0x8] sm:$0xff]  ;;  %s639_s13 = sshll.u32 %s968_s25, 2  ;;  %v745_v12 = vld [vmem:[%s960_s1] sm:$0xff]  ;;  %v755_v14 = vld [vmem:[%s962_s3 + $0x10] sm:$0xff]  ;;  %s641_s9 = sshll.u32 %s968_s25, 3 }
  0x11   : > { %376 = vmatpush.bf16.msra.mxu0 %v751_v1  ;;  %s291_s18 = scalar_lea.vmem %s959_s0, %s639_s13  ;;  %v754_v15 = vld [vmem:[%s962_s3 + $0x8] sm:$0xff]  ;;  %v753_v16 = vld [vmem:[%s962_s3] sm:$0xff]  ;;  %v768_v17 = vld [vmem:[#allocation2 + $0x38] sm:$0xff]  ;;  %s297_s13 = scalar_lea.vmem %s966_s7, %s641_s9 }
  0x12   : > { %459 = vmatpush.bf16.msra.mxu1 %v759_v3  ;;  %v744_v13 = vld [vmem:[%s291_s18] sm:$0xff]  ;;  %547 = vmatpush.bf16.msra.mxu2 %v768_v17  ;;  %v767_v18 = vld [vmem:[#allocation2 + $0x30] sm:$0xff]  ;;  %v766_v19 = vld [vmem:[#allocation2 + $0x28] sm:$0xff] }
  0x13   : > { %v765_v20 = vld [vmem:[#allocation2 + $0x20] sm:$0xff]  ;;  %v764_v27 = vld [vmem:[#allocation2 + $0x18] sm:$0xff]  ;;  %v763_v28 = vld [vmem:[#allocation2 + $0x10] sm:$0xff] }
  0x14   : > { %v790_v22 = vld [vmem:[%s961_s2] ss:$0 sm:$0xff]  ;;  %v762_v29 = vld [vmem:[#allocation2 + $0x8] sm:$0xff] }
  0x15   : > { %377 = vmatpush.bf16.msra.mxu0 %v750_v4  ;;  %v761_v30 = vld [vmem:[#allocation2] sm:$0xff] }
  0x16   : > { %460 = vmatpush.bf16.msra.mxu1 %v758_v5  ;;  %548 = vmatpush.bf16.msra.mxu2 %v767_v18  ;;  %v791_v32 = vld [vmem:[%s963_s4] ss:$0 sm:$0xff] }
  0x17   : > { %v792_v39 = vld [vmem:[%s965_s6] ss:$0 sm:$0xff] }
  0x19   : > { %378 = vmatpush.bf16.msra.mxu0 %v749_v6 }
  0x1a   : > { %461 = vmatpush.bf16.msra.mxu1 %v757_v7  ;;  %549 = vmatpush.bf16.msra.mxu2 %v766_v19 }
  0x1d   : > { %379 = vmatpush.bf16.msra.mxu0 %v748_v8 }
  0x1e   : > { %462 = vmatpush.bf16.msra.mxu1 %v756_v9  ;;  %550 = vmatpush.bf16.msra.mxu2 %v765_v20 }
  0x21   : > { %380 = vmatpush.bf16.msra.mxu0 %v747_v10 }
  0x22   : > { %463 = vmatpush.bf16.msra.mxu1 %v755_v14  ;;  %551 = vmatpush.bf16.msra.mxu2 %v764_v27 }
  0x25   : > { %381 = vmatpush.bf16.msra.mxu0 %v746_v11 }
  0x26   : > { %464 = vmatpush.bf16.msra.mxu1 %v754_v15  ;;  %552 = vmatpush.bf16.msra.mxu2 %v763_v28 }
  0x29   : > { %382 = vmatpush.bf16.msra.mxu0 %v745_v12 }
  0x2a   : > { %465 = vmatpush.bf16.msra.mxu1 %v753_v16  ;;  %553 = vmatpush.bf16.msra.mxu2 %v762_v29 }
  0x2c   : > { %383 = vmatmul.bf16.vlgmr.msra.gmra.mxu0 %v744_v13 }
  0x2e   : > { %554 = vmatpush.bf16.msra.mxu2 %v761_v30 }
  0xa9   : > { %v384_v21 = vpop.f32.mrf.mxu0 }
  0xaa   : > { %v385_v24 = vadd.f32 %v790_v22, %v384_v21 }
  0xb1   : > { %v386_v23 = vpop.f32.mrf.mxu0 }
  0xb2   : > { %v387_v25 = vadd.f32 %v790_v22, %v386_v23 }
  0xb4   : > { %v389_v26 = vpack.c.bf16 %v387_v25, %v385_v24 }
  0xb6   : > { %466 = vmatmul.bf16.vlgmr.msra.gmra.mxu1 %v389_v26 }
 0x133   : > { %v467_v31 = vpop.f32.mrf.mxu1 }
 0x134   : > { %v468_v33 = vadd.f32 %v791_v32, %v467_v31 }
 0x136   : > { %v476_v36 = vmax.f32 %v468_v33, 0.0 }
 0x13b   : > { %v469_v34 = vpop.f32.mrf.mxu1 }
 0x13c   : > { %v470_v35 = vadd.f32 %v791_v32, %v469_v34 }
 0x13e   : > { %v477_v37 = vmax.f32 %v470_v35, 0.0 }
 0x140   : > { %v478_v38 = vpack.c.bf16 %v477_v37, %v476_v36 }
 0x142   : > { %555 = vmatmul.bf16.vlgmr.msra.gmra.mxu2 %v478_v38 }
 0x1c5   : > { %v556_v40 = vpop.f32.mrf.mxu2 }
 0x1c6   : > { %v557_v41 = vadd.f32 %v792_v39, %v556_v40 }
 0x1c8   : > { %561 = vst [vmem:[%s297_s13] sm:$0xff] %v557_v41 }
 0x1cd   : > { %v558_v42 = vpop.f32.mrf.mxu2 }
 0x1ce   : > { %v559_v43 = vadd.f32 %v792_v39, %v558_v42 }
 0x1d0   : > { %562 = vst [vmem:[%s297_s13 + $0x8] sm:$0xff] %v559_v43 }
 0x1d1 PF: > { %s18_s24 = sadd.s32 1, %s833_s24  }
 0x1d2   : > { %p15_p7 = scmp.ge.s32.totalorder %s18_s24, 6  }
 0x1d4   :  { %17 = sbr.rel (!%p15_p7) target bundleno = 1 (0x1), region = 83 }
 0x1d9   :  { %585 = vsyncpa [#allocation3], 1 }
 0x1da   :  { %587 = vsyncpa [#allocation3 + $0x1], 1 }

</bundles_post_ra>
